<compile_context>
chip_gen: v7x
topology: tpu7x:2x2x1
jax: 0.10.0
libtpu: 0.0.40
codegen_flags: <defaults>
</compile_context>

<pallas_src>
import functools

import jax
import jax.numpy as jnp
from jax.experimental import pallas as pl
from jax.experimental.pallas import tpu as pltpu


_LANE = 128        # lane quantum (last dim)
_SUBLANE = 8       # sublane quantum (second-to-last dim)
_FALLBACK_VMEM_BYTES = 64 * 1024 * 1024   # conservative (v7x-sized) fallback


def _vmem_capacity_bytes():
    """Generation-aware VMEM capacity (falls back to a v7x-safe 64 MiB)."""
    try:
        return int(pltpu.get_tpu_info().vmem_capacity_bytes)
    except Exception:   # pragma: no cover - robustness on unusual backends
        return _FALLBACK_VMEM_BYTES


def _round_up(x, q):
    return ((x + q - 1) // q) * q


def _divisor_tiles(dim, quant):
    """All divisors of `dim` that are multiples of `quant`, descending.

    `dim` is always a multiple of `quant` here (we pad in the wrapper)."""
    return sorted((d for d in range(quant, dim + 1, quant) if dim % d == 0),
                  reverse=True)


def _pick_tiles(h_pad, w_pad, bytes_per_px, tile_budget):
    """Largest lane/sublane-dense (TH, TW) dividing (h_pad, w_pad) under the
    VMEM tile budget; guarantees >=2 spatial tiles when cheaply possible so
    the parallel axes can shard across v7x's two TensorCores."""
    max_px = max(tile_budget // bytes_per_px, _SUBLANE * _LANE)
    ths = _divisor_tiles(h_pad, _SUBLANE)
    tws = _divisor_tiles(w_pad, _LANE)

    th, tw = ths[-1], tws[-1]          # fallback: minimal (8, 128) tile
    found = False
    for cand_tw in tws:                # prefer lane-dense (wide) tiles
        for cand_th in ths:
            if cand_th * cand_tw <= max_px:
                th, tw = cand_th, cand_tw
                found = True
                break
        if found:
            break

    # Megacore: if the whole image would be a single spatial tile, split it.
    if th == h_pad and tw == w_pad:
        if h_pad % (2 * _SUBLANE) == 0:
            th = h_pad // 2
        elif w_pad % (2 * _LANE) == 0:
            tw = w_pad // 2
    return th, tw


def _composite_kernel(bg_ref, stroke_ref, out_ref, *, nb, opacity_factor):
    """Grid step (i, j, n): composite strokes [n*nb, (n+1)*nb) onto the
    resident canvas tile (4, TH, TW)."""
    # Initialize the resident canvas tile from the background on step n == 0.
    @pl.when(pl.program_id(2) == 0)
    def _():
        out_ref[...] = bg_ref[...]

    # nb is tiny and static -> fully unrolled (equivalent to fori unroll=True).
    for k in range(nb):
        # Load + scale the stroke alpha once per stroke.
        a = stroke_ref[k, 3, :, :].astype(jnp.float32)
        if opacity_factor != 1.0:          # static Python check
            a = a * opacity_factor
        # Per-channel blend keeps intermediates one channel wide (no full
        # 4-channel f32 copy of the stroke tile in VMEM).
        for c in range(4):
            s_c = stroke_ref[k, c, :, :].astype(jnp.float32)
            cv = out_ref[c]
            # canvas*(1-a) + a*stroke  ==  c + a*(s - c)
            out_ref[c] = cv + a * (s_c - cv)


def painting_forward(background_img, strokes, h, w, opacity_factor=1.0):
    """JAX/Pallas equivalent of Painting.forward(h, w) with defaults
    (use_alpha=True, return_alphas=False, efficient=False).

    background_img: (1, C, Hb, Wb), C in {3, 4} (or None), float32
    strokes:        (N, 4, h, w) rasterized brush strokes (any float dtype)
    returns:        (1, 4, h, w) float32 canvas
    """
    return _painting_forward(background_img, strokes, h, w,
                             float(opacity_factor))


@functools.partial(jax.jit, static_argnums=(2, 3, 4))
def _painting_forward(background_img, strokes, h, w, opacity_factor):
    # --- glue: alpha channel + bicubic resize (T.Resize(..., BICUBIC)) ---
    if background_img is None:
        canvas0 = jnp.ones((4, h, w), jnp.float32)
    else:
        bg = background_img
        if bg.shape[1] == 3:
            alpha_pad = jnp.zeros((1, 1, bg.shape[2], bg.shape[3]), bg.dtype)
            bg = jnp.concatenate([bg, alpha_pad], axis=1)
        canvas0 = jax.image.resize(bg, (1, 4, h, w), method="bicubic")
        canvas0 = canvas0[0].astype(jnp.float32)        # (4, h, w)
    canvas0 = canvas0.at[3].set(1.0)                    # canvas[:, 3] = 1

    n_strokes = strokes.shape[0]
    if n_strokes == 0:
        return canvas0[None]

    # --- pad to lane/sublane-dense extents (cropped after pallas_call) ---
    h_pad = _round_up(h, _SUBLANE)
    w_pad = _round_up(w, _LANE)

    # --- multi-stroke blocking (amortize per-grid-step overhead) ---
    nb = min(4, n_strokes)
    n_pad = _round_up(n_strokes, nb)

    # Stream strokes as bf16 (halves the dominant HBM term); canvas stays f32.
    strokes_q = strokes.astype(jnp.bfloat16)
    if (n_pad, h_pad, w_pad) != (n_strokes, h, w):
        # Zero-padded strokes have alpha == 0 -> identity blend (exact).
        strokes_q = jnp.pad(
            strokes_q,
            ((0, n_pad - n_strokes), (0, 0), (0, h_pad - h), (0, w_pad - w)))
    if (h_pad, w_pad) != (h, w):
        canvas_in = jnp.pad(canvas0, ((0, 0), (0, h_pad - h), (0, w_pad - w)))
    else:
        canvas_in = canvas0

    # --- generation-aware VMEM sizing ---
    vmem_cap = _vmem_capacity_bytes()
    tile_budget = int(vmem_cap * 0.45)                       # block buffers
    vmem_limit = min(int(vmem_cap * 0.75), 128 * 1024 * 1024)

    # Per-pixel VMEM bytes with default double-buffering:
    #   canvas out (4ch f32 x2) + background in (4ch f32 x2)
    #   + stroke in (nb strokes x 4ch bf16 x2)
    bytes_per_px = (4 * 4 * 2) + (4 * 4 * 2) + nb * (4 * 2 * 2)
    th, tw = _pick_tiles(h_pad, w_pad, bytes_per_px, tile_budget)
    grid = (h_pad // th, w_pad // tw, n_pad // nb)

    kernel = functools.partial(_composite_kernel, nb=nb,
                               opacity_factor=float(opacity_factor))

    cost = pl.CostEstimate(
        flops=12 * h_pad * w_pad * n_pad,
        transcendentals=0,
        bytes_accessed=(n_pad * 4 * h_pad * w_pad * 2          # bf16 strokes
                        + 2 * 4 * h_pad * w_pad * 4),          # canvas r + w
    )

    out = pl.pallas_call(
        kernel,
        out_shape=jax.ShapeDtypeStruct((4, h_pad, w_pad), jnp.float32),
        grid_spec=pltpu.PrefetchScalarGridSpec(
            num_scalar_prefetch=0,
            grid=grid,
            in_specs=[
                # Background tile: index_map ignores the stroke axis, so its
                # DMA is elided while the spatial tile is unchanged.
                pl.BlockSpec((4, th, tw), lambda i, j, n: (0, i, j)),
                # nb bf16 strokes per step.
                pl.BlockSpec((nb, 4, th, tw), lambda i, j, n: (n, 0, i, j)),
            ],
            # Same output block across the stroke axis -> canvas tile resident.
            out_specs=pl.BlockSpec((4, th, tw), lambda i, j, n: (0, i, j)),
        ),
        compiler_params=pltpu.CompilerParams(
            dimension_semantics=("parallel", "parallel", "arbitrary"),
            vmem_limit_bytes=vmem_limit,
        ),
        cost_estimate=cost,
        # Reuse canvas_in's HBM buffer for the output canvas.
        input_output_aliases={0: 0},
    )(canvas_in, strokes_q)

    out = out[:, :h, :w]                                 # crop the padding
    return out[None]                                     # (1, 4, h, w)


def _make_synthetic_strokes(key, n_strokes, h, w):
    """Deterministic stand-in for BrushStroke(h, w, param2img): soft elliptical
    blobs with random centers/colors. Shape (N, 4, h, w), channels = RGBA."""
    k1, k2, k3 = jax.random.split(key, 3)
    centers = jax.random.uniform(k1, (n_strokes, 2))               # in [0,1)
    colors = jax.random.uniform(k2, (n_strokes, 3))                # RGB
    sigmas = 0.05 + 0.15 * jax.random.uniform(k3, (n_strokes, 2))  # blob widths

    ys = jnp.linspace(0.0, 1.0, h)[None, :, None]                  # (1, h, 1)
    xs = jnp.linspace(0.0, 1.0, w)[None, None, :]                  # (1, 1, w)
    cy = centers[:, 0][:, None, None]
    cx = centers[:, 1][:, None, None]
    sy = sigmas[:, 0][:, None, None]
    sx = sigmas[:, 1][:, None, None]
    alpha = jnp.exp(-0.5 * (((ys - cy) / sy) ** 2 + ((xs - cx) / sx) ** 2))
    alpha = jnp.clip(alpha, 0.0, 1.0)                              # (N, h, w)

    rgb = jnp.broadcast_to(colors[:, :, None, None], (n_strokes, 3, h, w))
    strokes = jnp.concatenate([rgb, alpha[:, None, :, :]], axis=1)  # (N,4,h,w)
    return strokes.astype(jnp.float32)


def _reference_forward(background_img, strokes, h, w, opacity_factor=1.0):
    """Pure-JAX f32 reference of the same compositing loop (sanity check)."""
    bg = background_img
    if bg.shape[1] == 3:
        bg = jnp.concatenate(
            [bg, jnp.zeros((1, 1, bg.shape[2], bg.shape[3]), bg.dtype)], axis=1)
    canvas = jax.image.resize(bg, (1, 4, h, w), method="bicubic")
    canvas = canvas.at[:, 3].set(1.0)
    for i in range(strokes.shape[0]):
        s = strokes[i:i + 1]                      # (1, 4, h, w)
        a = s[:, 3:4] * opacity_factor
        canvas = canvas * (1.0 - a) + a * s
    return canvas


if __name__ == "__main__":
    key = jax.random.PRNGKey(0)
    k_bg, k_strokes = jax.random.split(key)

    h, w = 16, 16
    n_strokes = 8

    # Background image with 3 channels (exercises the alpha-padding branch).
    background_img = jax.random.uniform(k_bg, (1, 3, h, w), dtype=jnp.float32)
    strokes = _make_synthetic_strokes(k_strokes, n_strokes, h, w)

    # Reference inputs: the same bf16-rounded strokes the kernel streams.
    strokes_q = strokes.astype(jnp.bfloat16).astype(jnp.float32)

    for opacity in (1.0, 0.7):
        canvas = painting_forward(background_img, strokes, h, w,
                                  opacity_factor=opacity)
        canvas = jax.block_until_ready(canvas)
        assert canvas.shape == (1, 4, h, w)

        ref_q = _reference_forward(background_img, strokes_q, h, w,
                                   opacity_factor=opacity)
        assert jnp.allclose(canvas, ref_q, atol=1e-5, rtol=1e-5)

        ref_f32 = _reference_forward(background_img, strokes, h, w,
                                     opacity_factor=opacity)
        assert jnp.allclose(canvas, ref_f32, atol=3e-2, rtol=0)

    print("KERNEL_OK")
</pallas_src>

<mosaic_0001>
module attributes {stable_mosaic.version = 11 : i64} {
  func.func @_composite_kernel(%arg0: i32, %arg1: i32, %arg2: i32, %arg3: memref<4x8x128xf32, #tpu.memory_space<vmem>>, %arg4: memref<4x4x8x128xbf16, #tpu.memory_space<vmem>>, %arg5: memref<4x8x128xf32, #tpu.memory_space<vmem>>) attributes {dimension_semantics = [#tpu.dimension_semantics<parallel>, #tpu.dimension_semantics<parallel>, #tpu.dimension_semantics<arbitrary>], iteration_bounds = array<i64: 2, 1, 2>, scalar_prefetch = 0 : i64, scratch_operands = 0 : i64, tpu.core_type = #tpu.core_type<tc>, window_params = [{transform_indices = @transform_0, window_bounds = array<i64: 4, 8, 128>}, {transform_indices = @transform_1, window_bounds = array<i64: 4, 4, 8, 128>}, {transform_indices = @transform_2, window_bounds = array<i64: 4, 8, 128>}]} {
    %c0_i32 = arith.constant 0 : i32
    %0 = arith.cmpi eq, %arg2, %c0_i32 : i32
    %1 = arith.extui %0 : i1 to i32
    %c0_i32_0 = arith.constant 0 : i32
    %2 = arith.cmpi ne, %1, %c0_i32_0 : i32
    scf.if %2 {
      %c0_173 = arith.constant 0 : index
      %c0_174 = arith.constant 0 : index
      %c0_175 = arith.constant 0 : index
      %191 = vector.load %arg3[%c0_173, %c0_174, %c0_175] : memref<4x8x128xf32, #tpu.memory_space<vmem>>, vector<4x8x128xf32>
      %c0_176 = arith.constant 0 : index
      %c0_177 = arith.constant 0 : index
      %c0_178 = arith.constant 0 : index
      %192 = vector.load %arg5[%c0_176, %c0_177, %c0_178] : memref<4x8x128xf32, #tpu.memory_space<vmem>>, vector<4x8x128xf32>
      tpu.vector_store %arg5[%c0_176, %c0_177, %c0_178], %191 {strides = array<i32>} : memref<4x8x128xf32, #tpu.memory_space<vmem>>, vector<4x8x128xf32>,
    } else {
    }
    %c0 = arith.constant 0 : index
    %c3 = arith.constant 3 : index
    %c0_1 = arith.constant 0 : index
    %c0_2 = arith.constant 0 : index
    %3 = vector.load %arg4[%c0, %c3, %c0_1, %c0_2] : memref<4x4x8x128xbf16, #tpu.memory_space<vmem>>, vector<1x1x8x128xbf16>
    %4 = vector.shape_cast %3 : vector<1x1x8x128xbf16> to vector<8x128xbf16>
    %5 = arith.extf %4 : vector<8x128xbf16> to vector<8x128xf32>
    %c0_3 = arith.constant 0 : index
    %c0_4 = arith.constant 0 : index
    %c0_5 = arith.constant 0 : index
    %c0_6 = arith.constant 0 : index
    %6 = vector.load %arg4[%c0_3, %c0_4, %c0_5, %c0_6] : memref<4x4x8x128xbf16, #tpu.memory_space<vmem>>, vector<1x1x8x128xbf16>
    %7 = vector.shape_cast %6 : vector<1x1x8x128xbf16> to vector<8x128xbf16>
    %8 = arith.extf %7 : vector<8x128xbf16> to vector<8x128xf32>
    %c0_7 = arith.constant 0 : index
    %c0_8 = arith.constant 0 : index
    %c0_9 = arith.constant 0 : index
    %9 = vector.load %arg5[%c0_7, %c0_8, %c0_9] : memref<4x8x128xf32, #tpu.memory_space<vmem>>, vector<1x8x128xf32>
    %10 = vector.shape_cast %9 : vector<1x8x128xf32> to vector<8x128xf32>
    %11 = arith.subf %8, %10 : vector<8x128xf32>
    %12 = arith.mulf %5, %11 : vector<8x128xf32>
    %13 = arith.addf %10, %12 : vector<8x128xf32>
    %c0_10 = arith.constant 0 : index
    %c0_11 = arith.constant 0 : index
    %c0_12 = arith.constant 0 : index
    %14 = vector.load %arg5[%c0_10, %c0_11, %c0_12] : memref<4x8x128xf32, #tpu.memory_space<vmem>>, vector<1x8x128xf32>
    %15 = vector.shape_cast %14 : vector<1x8x128xf32> to vector<8x128xf32>
    %16 = vector.shape_cast %13 : vector<8x128xf32> to vector<1x8x128xf32>
    tpu.vector_store %arg5[%c0_10, %c0_11, %c0_12], %16 {strides = array<i32>} : memref<4x8x128xf32, #tpu.memory_space<vmem>>, vector<1x8x128xf32>,
    %c0_13 = arith.constant 0 : index
    %c1 = arith.constant 1 : index
    %c0_14 = arith.constant 0 : index
    %c0_15 = arith.constant 0 : index
    %17 = vector.load %arg4[%c0_13, %c1, %c0_14, %c0_15] : memref<4x4x8x128xbf16, #tpu.memory_space<vmem>>, vector<1x1x8x128xbf16>
    %18 = vector.shape_cast %17 : vector<1x1x8x128xbf16> to vector<8x128xbf16>
    %19 = arith.extf %18 : vector<8x128xbf16> to vector<8x128xf32>
    %c1_16 = arith.constant 1 : index
    %c0_17 = arith.constant 0 : index
    %c0_18 = arith.constant 0 : index
    %20 = vector.load %arg5[%c1_16, %c0_17, %c0_18] : memref<4x8x128xf32, #tpu.memory_space<vmem>>, vector<1x8x128xf32>
    %21 = vector.shape_cast %20 : vector<1x8x128xf32> to vector<8x128xf32>
    %22 = arith.subf %19, %21 : vector<8x128xf32>
    %23 = arith.mulf %5, %22 : vector<8x128xf32>
    %24 = arith.addf %21, %23 : vector<8x128xf32>
    %c1_19 = arith.constant 1 : index
    %c0_20 = arith.constant 0 : index
    %c0_21 = arith.constant 0 : index
    %25 = vector.load %arg5[%c1_19, %c0_20, %c0_21] : memref<4x8x128xf32, #tpu.memory_space<vmem>>, vector<1x8x128xf32>
    %26 = vector.shape_cast %25 : vector<1x8x128xf32> to vector<8x128xf32>
    %27 = vector.shape_cast %24 : vector<8x128xf32> to vector<1x8x128xf32>
    tpu.vector_store %arg5[%c1_19, %c0_20, %c0_21], %27 {strides = array<i32>} : memref<4x8x128xf32, #tpu.memory_space<vmem>>, vector<1x8x128xf32>,
    %c0_22 = arith.constant 0 : index
    %c2 = arith.constant 2 : index
    %c0_23 = arith.constant 0 : index
    %c0_24 = arith.constant 0 : index
    %28 = vector.load %arg4[%c0_22, %c2, %c0_23, %c0_24] : memref<4x4x8x128xbf16, #tpu.memory_space<vmem>>, vector<1x1x8x128xbf16>
    %29 = vector.shape_cast %28 : vector<1x1x8x128xbf16> to vector<8x128xbf16>
    %30 = arith.extf %29 : vector<8x128xbf16> to vector<8x128xf32>
    %c2_25 = arith.constant 2 : index
    %c0_26 = arith.constant 0 : index
    %c0_27 = arith.constant 0 : index
    %31 = vector.load %arg5[%c2_25, %c0_26, %c0_27] : memref<4x8x128xf32, #tpu.memory_space<vmem>>, vector<1x8x128xf32>
    %32 = vector.shape_cast %31 : vector<1x8x128xf32> to vector<8x128xf32>
    %33 = arith.subf %30, %32 : vector<8x128xf32>
    %34 = arith.mulf %5, %33 : vector<8x128xf32>
    %35 = arith.addf %32, %34 : vector<8x128xf32>
    %c2_28 = arith.constant 2 : index
    %c0_29 = arith.constant 0 : index
    %c0_30 = arith.constant 0 : index
    %36 = vector.load %arg5[%c2_28, %c0_29, %c0_30] : memref<4x8x128xf32, #tpu.memory_space<vmem>>, vector<1x8x128xf32>
    %37 = vector.shape_cast %36 : vector<1x8x128xf32> to vector<8x128xf32>
    %38 = vector.shape_cast %35 : vector<8x128xf32> to vector<1x8x128xf32>
    tpu.vector_store %arg5[%c2_28, %c0_29, %c0_30], %38 {strides = array<i32>} : memref<4x8x128xf32, #tpu.memory_space<vmem>>, vector<1x8x128xf32>,
    %c0_31 = arith.constant 0 : index
    %c3_32 = arith.constant 3 : index
    %c0_33 = arith.constant 0 : index
    %c0_34 = arith.constant 0 : index
    %39 = vector.load %arg4[%c0_31, %c3_32, %c0_33, %c0_34] : memref<4x4x8x128xbf16, #tpu.memory_space<vmem>>, vector<1x1x8x128xbf16>
    %40 = vector.shape_cast %39 : vector<1x1x8x128xbf16> to vector<8x128xbf16>
    %41 = arith.extf %40 : vector<8x128xbf16> to vector<8x128xf32>
    %c3_35 = arith.constant 3 : index
    %c0_36 = arith.constant 0 : index
    %c0_37 = arith.constant 0 : index
    %42 = vector.load %arg5[%c3_35, %c0_36, %c0_37] : memref<4x8x128xf32, #tpu.memory_space<vmem>>, vector<1x8x128xf32>
    %43 = vector.shape_cast %42 : vector<1x8x128xf32> to vector<8x128xf32>
    %44 = arith.subf %41, %43 : vector<8x128xf32>
    %45 = arith.mulf %5, %44 : vector<8x128xf32>
    %46 = arith.addf %43, %45 : vector<8x128xf32>
    %c3_38 = arith.constant 3 : index
    %c0_39 = arith.constant 0 : index
    %c0_40 = arith.constant 0 : index
    %47 = vector.load %arg5[%c3_38, %c0_39, %c0_40] : memref<4x8x128xf32, #tpu.memory_space<vmem>>, vector<1x8x128xf32>
    %48 = vector.shape_cast %47 : vector<1x8x128xf32> to vector<8x128xf32>
    %49 = vector.shape_cast %46 : vector<8x128xf32> to vector<1x8x128xf32>
    tpu.vector_store %arg5[%c3_38, %c0_39, %c0_40], %49 {strides = array<i32>} : memref<4x8x128xf32, #tpu.memory_space<vmem>>, vector<1x8x128xf32>,
    %c1_41 = arith.constant 1 : index
    %c3_42 = arith.constant 3 : index
    %c0_43 = arith.constant 0 : index
    %c0_44 = arith.constant 0 : index
    %50 = vector.load %arg4[%c1_41, %c3_42, %c0_43, %c0_44] : memref<4x4x8x128xbf16, #tpu.memory_space<vmem>>, vector<1x1x8x128xbf16>
    %51 = vector.shape_cast %50 : vector<1x1x8x128xbf16> to vector<8x128xbf16>
    %52 = arith.extf %51 : vector<8x128xbf16> to vector<8x128xf32>
    %c1_45 = arith.constant 1 : index
    %c0_46 = arith.constant 0 : index
    %c0_47 = arith.constant 0 : index
    %c0_48 = arith.constant 0 : index
    %53 = vector.load %arg4[%c1_45, %c0_46, %c0_47, %c0_48] : memref<4x4x8x128xbf16, #tpu.memory_space<vmem>>, vector<1x1x8x128xbf16>
    %54 = vector.shape_cast %53 : vector<1x1x8x128xbf16> to vector<8x128xbf16>
    %55 = arith.extf %54 : vector<8x128xbf16> to vector<8x128xf32>
    %c0_49 = arith.constant 0 : index
    %c0_50 = arith.constant 0 : index
    %c0_51 = arith.constant 0 : index
    %56 = vector.load %arg5[%c0_49, %c0_50, %c0_51] : memref<4x8x128xf32, #tpu.memory_space<vmem>>, vector<1x8x128xf32>
    %57 = vector.shape_cast %56 : vector<1x8x128xf32> to vector<8x128xf32>
    %58 = arith.subf %55, %57 : vector<8x128xf32>
    %59 = arith.mulf %52, %58 : vector<8x128xf32>
    %60 = arith.addf %57, %59 : vector<8x128xf32>
    %c0_52 = arith.constant 0 : index
    %c0_53 = arith.constant 0 : index
    %c0_54 = arith.constant 0 : index
    %61 = vector.load %arg5[%c0_52, %c0_53, %c0_54] : memref<4x8x128xf32, #tpu.memory_space<vmem>>, vector<1x8x128xf32>
    %62 = vector.shape_cast %61 : vector<1x8x128xf32> to vector<8x128xf32>
    %63 = vector.shape_cast %60 : vector<8x128xf32> to vector<1x8x128xf32>
    tpu.vector_store %arg5[%c0_52, %c0_53, %c0_54], %63 {strides = array<i32>} : memref<4x8x128xf32, #tpu.memory_space<vmem>>, vector<1x8x128xf32>,
    %c1_55 = arith.constant 1 : index
    %c1_56 = arith.constant 1 : index
    %c0_57 = arith.constant 0 : index
    %c0_58 = arith.constant 0 : index
    %64 = vector.load %arg4[%c1_55, %c1_56, %c0_57, %c0_58] : memref<4x4x8x128xbf16, #tpu.memory_space<vmem>>, vector<1x1x8x128xbf16>
    %65 = vector.shape_cast %64 : vector<1x1x8x128xbf16> to vector<8x128xbf16>
    %66 = arith.extf %65 : vector<8x128xbf16> to vector<8x128xf32>
    %c1_59 = arith.constant 1 : index
    %c0_60 = arith.constant 0 : index
    %c0_61 = arith.constant 0 : index
    %67 = vector.load %arg5[%c1_59, %c0_60, %c0_61] : memref<4x8x128xf32, #tpu.memory_space<vmem>>, vector<1x8x128xf32>
    %68 = vector.shape_cast %67 : vector<1x8x128xf32> to vector<8x128xf32>
    %69 = arith.subf %66, %68 : vector<8x128xf32>
    %70 = arith.mulf %52, %69 : vector<8x128xf32>
    %71 = arith.addf %68, %70 : vector<8x128xf32>
    %c1_62 = arith.constant 1 : index
    %c0_63 = arith.constant 0 : index
    %c0_64 = arith.constant 0 : index
    %72 = vector.load %arg5[%c1_62, %c0_63, %c0_64] : memref<4x8x128xf32, #tpu.memory_space<vmem>>, vector<1x8x128xf32>
    %73 = vector.shape_cast %72 : vector<1x8x128xf32> to vector<8x128xf32>
    %74 = vector.shape_cast %71 : vector<8x128xf32> to vector<1x8x128xf32>
    tpu.vector_store %arg5[%c1_62, %c0_63, %c0_64], %74 {strides = array<i32>} : memref<4x8x128xf32, #tpu.memory_space<vmem>>, vector<1x8x128xf32>,
    %c1_65 = arith.constant 1 : index
    %c2_66 = arith.constant 2 : index
    %c0_67 = arith.constant 0 : index
    %c0_68 = arith.constant 0 : index
    %75 = vector.load %arg4[%c1_65, %c2_66, %c0_67, %c0_68] : memref<4x4x8x128xbf16, #tpu.memory_space<vmem>>, vector<1x1x8x128xbf16>
    %76 = vector.shape_cast %75 : vector<1x1x8x128xbf16> to vector<8x128xbf16>
    %77 = arith.extf %76 : vector<8x128xbf16> to vector<8x128xf32>
    %c2_69 = arith.constant 2 : index
    %c0_70 = arith.constant 0 : index
    %c0_71 = arith.constant 0 : index
    %78 = vector.load %arg5[%c2_69, %c0_70, %c0_71] : memref<4x8x128xf32, #tpu.memory_space<vmem>>, vector<1x8x128xf32>
    %79 = vector.shape_cast %78 : vector<1x8x128xf32> to vector<8x128xf32>
    %80 = arith.subf %77, %79 : vector<8x128xf32>
    %81 = arith.mulf %52, %80 : vector<8x128xf32>
    %82 = arith.addf %79, %81 : vector<8x128xf32>
    %c2_72 = arith.constant 2 : index
    %c0_73 = arith.constant 0 : index
    %c0_74 = arith.constant 0 : index
    %83 = vector.load %arg5[%c2_72, %c0_73, %c0_74] : memref<4x8x128xf32, #tpu.memory_space<vmem>>, vector<1x8x128xf32>
    %84 = vector.shape_cast %83 : vector<1x8x128xf32> to vector<8x128xf32>
    %85 = vector.shape_cast %82 : vector<8x128xf32> to vector<1x8x128xf32>
    tpu.vector_store %arg5[%c2_72, %c0_73, %c0_74], %85 {strides = array<i32>} : memref<4x8x128xf32, #tpu.memory_space<vmem>>, vector<1x8x128xf32>,
    %c1_75 = arith.constant 1 : index
    %c3_76 = arith.constant 3 : index
    %c0_77 = arith.constant 0 : index
    %c0_78 = arith.constant 0 : index
    %86 = vector.load %arg4[%c1_75, %c3_76, %c0_77, %c0_78] : memref<4x4x8x128xbf16, #tpu.memory_space<vmem>>, vector<1x1x8x128xbf16>
    %87 = vector.shape_cast %86 : vector<1x1x8x128xbf16> to vector<8x128xbf16>
    %88 = arith.extf %87 : vector<8x128xbf16> to vector<8x128xf32>
    %c3_79 = arith.constant 3 : index
    %c0_80 = arith.constant 0 : index
    %c0_81 = arith.constant 0 : index
    %89 = vector.load %arg5[%c3_79, %c0_80, %c0_81] : memref<4x8x128xf32, #tpu.memory_space<vmem>>, vector<1x8x128xf32>
    %90 = vector.shape_cast %89 : vector<1x8x128xf32> to vector<8x128xf32>
    %91 = arith.subf %88, %90 : vector<8x128xf32>
    %92 = arith.mulf %52, %91 : vector<8x128xf32>
    %93 = arith.addf %90, %92 : vector<8x128xf32>
    %c3_82 = arith.constant 3 : index
    %c0_83 = arith.constant 0 : index
    %c0_84 = arith.constant 0 : index
    %94 = vector.load %arg5[%c3_82, %c0_83, %c0_84] : memref<4x8x128xf32, #tpu.memory_space<vmem>>, vector<1x8x128xf32>
    %95 = vector.shape_cast %94 : vector<1x8x128xf32> to vector<8x128xf32>
    %96 = vector.shape_cast %93 : vector<8x128xf32> to vector<1x8x128xf32>
    tpu.vector_store %arg5[%c3_82, %c0_83, %c0_84], %96 {strides = array<i32>} : memref<4x8x128xf32, #tpu.memory_space<vmem>>, vector<1x8x128xf32>,
    %c2_85 = arith.constant 2 : index
    %c3_86 = arith.constant 3 : index
    %c0_87 = arith.constant 0 : index
    %c0_88 = arith.constant 0 : index
    %97 = vector.load %arg4[%c2_85, %c3_86, %c0_87, %c0_88] : memref<4x4x8x128xbf16, #tpu.memory_space<vmem>>, vector<1x1x8x128xbf16>
    %98 = vector.shape_cast %97 : vector<1x1x8x128xbf16> to vector<8x128xbf16>
    %99 = arith.extf %98 : vector<8x128xbf16> to vector<8x128xf32>
    %c2_89 = arith.constant 2 : index
    %c0_90 = arith.constant 0 : index
    %c0_91 = arith.constant 0 : index
    %c0_92 = arith.constant 0 : index
    %100 = vector.load %arg4[%c2_89, %c0_90, %c0_91, %c0_92] : memref<4x4x8x128xbf16, #tpu.memory_space<vmem>>, vector<1x1x8x128xbf16>
    %101 = vector.shape_cast %100 : vector<1x1x8x128xbf16> to vector<8x128xbf16>
    %102 = arith.extf %101 : vector<8x128xbf16> to vector<8x128xf32>
    %c0_93 = arith.constant 0 : index
    %c0_94 = arith.constant 0 : index
    %c0_95 = arith.constant 0 : index
    %103 = vector.load %arg5[%c0_93, %c0_94, %c0_95] : memref<4x8x128xf32, #tpu.memory_space<vmem>>, vector<1x8x128xf32>
    %104 = vector.shape_cast %103 : vector<1x8x128xf32> to vector<8x128xf32>
    %105 = arith.subf %102, %104 : vector<8x128xf32>
    %106 = arith.mulf %99, %105 : vector<8x128xf32>
    %107 = arith.addf %104, %106 : vector<8x128xf32>
    %c0_96 = arith.constant 0 : index
    %c0_97 = arith.constant 0 : index
    %c0_98 = arith.constant 0 : index
    %108 = vector.load %arg5[%c0_96, %c0_97, %c0_98] : memref<4x8x128xf32, #tpu.memory_space<vmem>>, vector<1x8x128xf32>
    %109 = vector.shape_cast %108 : vector<1x8x128xf32> to vector<8x128xf32>
    %110 = vector.shape_cast %107 : vector<8x128xf32> to vector<1x8x128xf32>
    tpu.vector_store %arg5[%c0_96, %c0_97, %c0_98], %110 {strides = array<i32>} : memref<4x8x128xf32, #tpu.memory_space<vmem>>, vector<1x8x128xf32>,
    %c2_99 = arith.constant 2 : index
    %c1_100 = arith.constant 1 : index
    %c0_101 = arith.constant 0 : index
    %c0_102 = arith.constant 0 : index
    %111 = vector.load %arg4[%c2_99, %c1_100, %c0_101, %c0_102] : memref<4x4x8x128xbf16, #tpu.memory_space<vmem>>, vector<1x1x8x128xbf16>
    %112 = vector.shape_cast %111 : vector<1x1x8x128xbf16> to vector<8x128xbf16>
    %113 = arith.extf %112 : vector<8x128xbf16> to vector<8x128xf32>
    %c1_103 = arith.constant 1 : index
    %c0_104 = arith.constant 0 : index
    %c0_105 = arith.constant 0 : index
    %114 = vector.load %arg5[%c1_103, %c0_104, %c0_105] : memref<4x8x128xf32, #tpu.memory_space<vmem>>, vector<1x8x128xf32>
    %115 = vector.shape_cast %114 : vector<1x8x128xf32> to vector<8x128xf32>
    %116 = arith.subf %113, %115 : vector<8x128xf32>
    %117 = arith.mulf %99, %116 : vector<8x128xf32>
    %118 = arith.addf %115, %117 : vector<8x128xf32>
    %c1_106 = arith.constant 1 : index
    %c0_107 = arith.constant 0 : index
    %c0_108 = arith.constant 0 : index
    %119 = vector.load %arg5[%c1_106, %c0_107, %c0_108] : memref<4x8x128xf32, #tpu.memory_space<vmem>>, vector<1x8x128xf32>
    %120 = vector.shape_cast %119 : vector<1x8x128xf32> to vector<8x128xf32>
    %121 = vector.shape_cast %118 : vector<8x128xf32> to vector<1x8x128xf32>
    tpu.vector_store %arg5[%c1_106, %c0_107, %c0_108], %121 {strides = array<i32>} : memref<4x8x128xf32, #tpu.memory_space<vmem>>, vector<1x8x128xf32>,
    %c2_109 = arith.constant 2 : index
    %c2_110 = arith.constant 2 : index
    %c0_111 = arith.constant 0 : index
    %c0_112 = arith.constant 0 : index
    %122 = vector.load %arg4[%c2_109, %c2_110, %c0_111, %c0_112] : memref<4x4x8x128xbf16, #tpu.memory_space<vmem>>, vector<1x1x8x128xbf16>
    %123 = vector.shape_cast %122 : vector<1x1x8x128xbf16> to vector<8x128xbf16>
    %124 = arith.extf %123 : vector<8x128xbf16> to vector<8x128xf32>
    %c2_113 = arith.constant 2 : index
    %c0_114 = arith.constant 0 : index
    %c0_115 = arith.constant 0 : index
    %125 = vector.load %arg5[%c2_113, %c0_114, %c0_115] : memref<4x8x128xf32, #tpu.memory_space<vmem>>, vector<1x8x128xf32>
    %126 = vector.shape_cast %125 : vector<1x8x128xf32> to vector<8x128xf32>
    %127 = arith.subf %124, %126 : vector<8x128xf32>
    %128 = arith.mulf %99, %127 : vector<8x128xf32>
    %129 = arith.addf %126, %128 : vector<8x128xf32>
    %c2_116 = arith.constant 2 : index
    %c0_117 = arith.constant 0 : index
    %c0_118 = arith.constant 0 : index
    %130 = vector.load %arg5[%c2_116, %c0_117, %c0_118] : memref<4x8x128xf32, #tpu.memory_space<vmem>>, vector<1x8x128xf32>
    %131 = vector.shape_cast %130 : vector<1x8x128xf32> to vector<8x128xf32>
    %132 = vector.shape_cast %129 : vector<8x128xf32> to vector<1x8x128xf32>
    tpu.vector_store %arg5[%c2_116, %c0_117, %c0_118], %132 {strides = array<i32>} : memref<4x8x128xf32, #tpu.memory_space<vmem>>, vector<1x8x128xf32>,
    %c2_119 = arith.constant 2 : index
    %c3_120 = arith.constant 3 : index
    %c0_121 = arith.constant 0 : index
    %c0_122 = arith.constant 0 : index
    %133 = vector.load %arg4[%c2_119, %c3_120, %c0_121, %c0_122] : memref<4x4x8x128xbf16, #tpu.memory_space<vmem>>, vector<1x1x8x128xbf16>
    %134 = vector.shape_cast %133 : vector<1x1x8x128xbf16> to vector<8x128xbf16>
    %135 = arith.extf %134 : vector<8x128xbf16> to vector<8x128xf32>
    %c3_123 = arith.constant 3 : index
    %c0_124 = arith.constant 0 : index
    %c0_125 = arith.constant 0 : index
    %136 = vector.load %arg5[%c3_123, %c0_124, %c0_125] : memref<4x8x128xf32, #tpu.memory_space<vmem>>, vector<1x8x128xf32>
    %137 = vector.shape_cast %136 : vector<1x8x128xf32> to vector<8x128xf32>
    %138 = arith.subf %135, %137 : vector<8x128xf32>
    %139 = arith.mulf %99, %138 : vector<8x128xf32>
    %140 = arith.addf %137, %139 : vector<8x128xf32>
    %c3_126 = arith.constant 3 : index
    %c0_127 = arith.constant 0 : index
    %c0_128 = arith.constant 0 : index
    %141 = vector.load %arg5[%c3_126, %c0_127, %c0_128] : memref<4x8x128xf32, #tpu.memory_space<vmem>>, vector<1x8x128xf32>
    %142 = vector.shape_cast %141 : vector<1x8x128xf32> to vector<8x128xf32>
    %143 = vector.shape_cast %140 : vector<8x128xf32> to vector<1x8x128xf32>
    tpu.vector_store %arg5[%c3_126, %c0_127, %c0_128], %143 {strides = array<i32>} : memref<4x8x128xf32, #tpu.memory_space<vmem>>, vector<1x8x128xf32>,
    %c3_129 = arith.constant 3 : index
    %c3_130 = arith.constant 3 : index
    %c0_131 = arith.constant 0 : index
    %c0_132 = arith.constant 0 : index
    %144 = vector.load %arg4[%c3_129, %c3_130, %c0_131, %c0_132] : memref<4x4x8x128xbf16, #tpu.memory_space<vmem>>, vector<1x1x8x128xbf16>
    %145 = vector.shape_cast %144 : vector<1x1x8x128xbf16> to vector<8x128xbf16>
    %146 = arith.extf %145 : vector<8x128xbf16> to vector<8x128xf32>
    %c3_133 = arith.constant 3 : index
    %c0_134 = arith.constant 0 : index
    %c0_135 = arith.constant 0 : index
    %c0_136 = arith.constant 0 : index
    %147 = vector.load %arg4[%c3_133, %c0_134, %c0_135, %c0_136] : memref<4x4x8x128xbf16, #tpu.memory_space<vmem>>, vector<1x1x8x128xbf16>
    %148 = vector.shape_cast %147 : vector<1x1x8x128xbf16> to vector<8x128xbf16>
    %149 = arith.extf %148 : vector<8x128xbf16> to vector<8x128xf32>
    %c0_137 = arith.constant 0 : index
    %c0_138 = arith.constant 0 : index
    %c0_139 = arith.constant 0 : index
    %150 = vector.load %arg5[%c0_137, %c0_138, %c0_139] : memref<4x8x128xf32, #tpu.memory_space<vmem>>, vector<1x8x128xf32>
    %151 = vector.shape_cast %150 : vector<1x8x128xf32> to vector<8x128xf32>
    %152 = arith.subf %149, %151 : vector<8x128xf32>
    %153 = arith.mulf %146, %152 : vector<8x128xf32>
    %154 = arith.addf %151, %153 : vector<8x128xf32>
    %c0_140 = arith.constant 0 : index
    %c0_141 = arith.constant 0 : index
    %c0_142 = arith.constant 0 : index
    %155 = vector.load %arg5[%c0_140, %c0_141, %c0_142] : memref<4x8x128xf32, #tpu.memory_space<vmem>>, vector<1x8x128xf32>
    %156 = vector.shape_cast %155 : vector<1x8x128xf32> to vector<8x128xf32>
    %157 = vector.shape_cast %154 : vector<8x128xf32> to vector<1x8x128xf32>
    tpu.vector_store %arg5[%c0_140, %c0_141, %c0_142], %157 {strides = array<i32>} : memref<4x8x128xf32, #tpu.memory_space<vmem>>, vector<1x8x128xf32>,
    %c3_143 = arith.constant 3 : index
    %c1_144 = arith.constant 1 : index
    %c0_145 = arith.constant 0 : index
    %c0_146 = arith.constant 0 : index
    %158 = vector.load %arg4[%c3_143, %c1_144, %c0_145, %c0_146] : memref<4x4x8x128xbf16, #tpu.memory_space<vmem>>, vector<1x1x8x128xbf16>
    %159 = vector.shape_cast %158 : vector<1x1x8x128xbf16> to vector<8x128xbf16>
    %160 = arith.extf %159 : vector<8x128xbf16> to vector<8x128xf32>
    %c1_147 = arith.constant 1 : index
    %c0_148 = arith.constant 0 : index
    %c0_149 = arith.constant 0 : index
    %161 = vector.load %arg5[%c1_147, %c0_148, %c0_149] : memref<4x8x128xf32, #tpu.memory_space<vmem>>, vector<1x8x128xf32>
    %162 = vector.shape_cast %161 : vector<1x8x128xf32> to vector<8x128xf32>
    %163 = arith.subf %160, %162 : vector<8x128xf32>
    %164 = arith.mulf %146, %163 : vector<8x128xf32>
    %165 = arith.addf %162, %164 : vector<8x128xf32>
    %c1_150 = arith.constant 1 : index
    %c0_151 = arith.constant 0 : index
    %c0_152 = arith.constant 0 : index
    %166 = vector.load %arg5[%c1_150, %c0_151, %c0_152] : memref<4x8x128xf32, #tpu.memory_space<vmem>>, vector<1x8x128xf32>
    %167 = vector.shape_cast %166 : vector<1x8x128xf32> to vector<8x128xf32>
    %168 = vector.shape_cast %165 : vector<8x128xf32> to vector<1x8x128xf32>
    tpu.vector_store %arg5[%c1_150, %c0_151, %c0_152], %168 {strides = array<i32>} : memref<4x8x128xf32, #tpu.memory_space<vmem>>, vector<1x8x128xf32>,
    %c3_153 = arith.constant 3 : index
    %c2_154 = arith.constant 2 : index
    %c0_155 = arith.constant 0 : index
    %c0_156 = arith.constant 0 : index
    %169 = vector.load %arg4[%c3_153, %c2_154, %c0_155, %c0_156] : memref<4x4x8x128xbf16, #tpu.memory_space<vmem>>, vector<1x1x8x128xbf16>
    %170 = vector.shape_cast %169 : vector<1x1x8x128xbf16> to vector<8x128xbf16>
    %171 = arith.extf %170 : vector<8x128xbf16> to vector<8x128xf32>
    %c2_157 = arith.constant 2 : index
    %c0_158 = arith.constant 0 : index
    %c0_159 = arith.constant 0 : index
    %172 = vector.load %arg5[%c2_157, %c0_158, %c0_159] : memref<4x8x128xf32, #tpu.memory_space<vmem>>, vector<1x8x128xf32>
    %173 = vector.shape_cast %172 : vector<1x8x128xf32> to vector<8x128xf32>
    %174 = arith.subf %171, %173 : vector<8x128xf32>
    %175 = arith.mulf %146, %174 : vector<8x128xf32>
    %176 = arith.addf %173, %175 : vector<8x128xf32>
    %c2_160 = arith.constant 2 : index
    %c0_161 = arith.constant 0 : index
    %c0_162 = arith.constant 0 : index
    %177 = vector.load %arg5[%c2_160, %c0_161, %c0_162] : memref<4x8x128xf32, #tpu.memory_space<vmem>>, vector<1x8x128xf32>
    %178 = vector.shape_cast %177 : vector<1x8x128xf32> to vector<8x128xf32>
    %179 = vector.shape_cast %176 : vector<8x128xf32> to vector<1x8x128xf32>
    tpu.vector_store %arg5[%c2_160, %c0_161, %c0_162], %179 {strides = array<i32>} : memref<4x8x128xf32, #tpu.memory_space<vmem>>, vector<1x8x128xf32>,
    %c3_163 = arith.constant 3 : index
    %c3_164 = arith.constant 3 : index
    %c0_165 = arith.constant 0 : index
    %c0_166 = arith.constant 0 : index
    %180 = vector.load %arg4[%c3_163, %c3_164, %c0_165, %c0_166] : memref<4x4x8x128xbf16, #tpu.memory_space<vmem>>, vector<1x1x8x128xbf16>
    %181 = vector.shape_cast %180 : vector<1x1x8x128xbf16> to vector<8x128xbf16>
    %182 = arith.extf %181 : vector<8x128xbf16> to vector<8x128xf32>
    %c3_167 = arith.constant 3 : index
    %c0_168 = arith.constant 0 : index
    %c0_169 = arith.constant 0 : index
    %183 = vector.load %arg5[%c3_167, %c0_168, %c0_169] : memref<4x8x128xf32, #tpu.memory_space<vmem>>, vector<1x8x128xf32>
    %184 = vector.shape_cast %183 : vector<1x8x128xf32> to vector<8x128xf32>
    %185 = arith.subf %182, %184 : vector<8x128xf32>
    %186 = arith.mulf %146, %185 : vector<8x128xf32>
    %187 = arith.addf %184, %186 : vector<8x128xf32>
    %c3_170 = arith.constant 3 : index
    %c0_171 = arith.constant 0 : index
    %c0_172 = arith.constant 0 : index
    %188 = vector.load %arg5[%c3_170, %c0_171, %c0_172] : memref<4x8x128xf32, #tpu.memory_space<vmem>>, vector<1x8x128xf32>
    %189 = vector.shape_cast %188 : vector<1x8x128xf32> to vector<8x128xf32>
    %190 = vector.shape_cast %187 : vector<8x128xf32> to vector<1x8x128xf32>
    tpu.vector_store %arg5[%c3_170, %c0_171, %c0_172], %190 {strides = array<i32>} : memref<4x8x128xf32, #tpu.memory_space<vmem>>, vector<1x8x128xf32>,
    return
  }
  func.func @transform_0(%arg0: i32, %arg1: i32, %arg2: i32) -> (i32, i32, i32) {
    %c0_i32 = arith.constant 0 : i32
    %c0_i32_0 = arith.constant 0 : i32
    return %c0_i32, %arg0, %arg1 : i32, i32, i32
  }
  func.func @transform_1(%arg0: i32, %arg1: i32, %arg2: i32) -> (i32, i32, i32, i32) {
    %c0_i32 = arith.constant 0 : i32
    %c0_i32_0 = arith.constant 0 : i32
    return %arg2, %c0_i32, %arg0, %arg1 : i32, i32, i32, i32
  }
  func.func @transform_2(%arg0: i32, %arg1: i32, %arg2: i32) -> (i32, i32, i32) {
    %c0_i32 = arith.constant 0 : i32
    %c0_i32_0 = arith.constant 0 : i32
    return %c0_i32, %arg0, %arg1 : i32, i32, i32
  }
}

</mosaic_0001>

<bundles_post_ra>
// kernel: _painting_forward.1
= control target key start
LH: loop header
LB: loop body
LE: loop exit
PB: predicated region body
PF: predicated region fallthrough
CT: control target
= control target key end

     0   :  { %s858_s9 = smov 0   ;;  %s860_s10 = smov 0   ;;  %s1049_s0 = inlined_call_operand.vmem [shape: f32[4,16,128], index: 0, kind: input, shape index: {}, may-alias: {0,2}]   ;;  %s1050_s1 = inlined_call_operand.vmem [shape: bf16[8,4,16,128], index: 1, kind: input, shape index: {}]   ;;  %s1051_s2 = inlined_call_operand.vmem [shape: f32[4,16,128], index: 2, kind: output, shape index: {}, may-alias: {0,2}]  }
   0x1   :  { %s862_s11 = smov 0   ;;  %s864_s12 = smov 0  }
   0x2   :  { %s866_s13 = smov 0   ;;  %s868_s14 = smov 0  }
   0x3   :  { %s870_s15 = smov 0   ;;  %s872_s16 = smov 0  }
   0x4   :  { %s874_s17 = smov 0  }
   0x5 LB: > { %s24_s18 = sadd.s32 1, %s833_s15  ;;  %s31_s19 = sadd.s32 1, %s837_s16  ;;  %s841_s17 = sphi %s874_s17, %s12_s17   ;;  %s837_s16 = sphi %s872_s16, %s1062_s16   ;;  %s833_s15 = sphi %s870_s15, %s1061_s15   ;;  %s829_s14 = sphi %s868_s14, %s1060_s14   ;;  %s825_s13 = sphi %s866_s13, %s1059_s13   ;;  %s821_s12 = sphi %s864_s12, %s1058_s12   ;;  %s817_s11 = sphi %s862_s11, %s1057_s11   ;;  %s813_s10 = sphi %s860_s10, %s1056_s10   ;;  %s809_s9 = sphi %s858_s9, %s1055_s9  }
   0x6   : > { %p25_p0 = scmp.ge.s32.totalorder %s24_s18, 2  ;;  %s636_s20 = sadd.s32 4294967295, %s841_s17  }
   0x7   : > { %p47_p1 = scmp.ne.s32.totalorder %s821_s12, %s817_s11  ;;  %s40_s21 = sadd.s32 1, %s821_s12 }
   0x8   : > { %s1064_s18 = smov (%p25_p0, %s24_s18), 0  ;;  %s1066_s19 = smov (!%p25_p0, %s31_s19), %s837_s16 }
   0x9   : > { %p48_p2 = scmp.eq.s32.totalorder %s841_s17, 0  ;;  %p33_p3 = scmp.ge.s32.totalorder %s1066_s19, 2 }
   0xa   : > { %s63_s22 = ssub.s32 %s833_s15, %s1064_s18  ;;  %p77_p5 = scmp.ne.s32.totalorder %s813_s10, %s809_s9 }
   0xb   : > { %p918_p4 = por %p48_p2, %p47_p1  ;;  %s1068_s19 = smov (%p33_p3, %s1066_s19), 0 }
   0xc   : > { %p926_p6 = por %p77_p5, %p48_p2  ;;  %p109_p7 = scmp.eq.s32.totalorder %s636_s20, 3 }
   0xd   : > { %s35_s25 = ssub.s32 %s837_s16, %s1068_s19  ;;  %s70_s26 = sadd.s32 1, %s813_s10 }
   0xe   : > { %p38_p8 = scmp.eq.s32.totalorder %s35_s25, 0  ;;  %s65_s27 = sor.u32 %s63_s22, %s35_s25 }
   0xf   : > { %p68_p9 = scmp.eq.s32.totalorder %s65_s27, 0  ;;  %p936_p10 = por %p109_p7, %p47_p1 }
  0x10   : > { %s941_s29 = scalar_select %p38_p8, %s821_s12, %s40_s21  }
  0x11   : > { %s944_s30 = scalar_select %p68_p9, %s813_s10, %s70_s26  }
  0x12   : > { %p639_p11 = scmp.ge.s32.totalorder %s841_s17, 4 }
  0x14   : > { %131 = sbr.rel (%p639_p11) target bundleno = 50 (0x32), region = 16 }
  0x1b   : > { %134 = sbr.rel (!%p918_p4) target bundleno = 34 (0x22), region = 20  ;;  %s136_s3 = sand.u32 (%p918_p4), 1, %s821_s12  }
  0x1c   : > { %s641_s4 = sshll.u32 (%p918_p4), %s837_s16, 3  ;;  %s640_s5 = sshll.u32 (%p918_p4), %s136_s3, 5 }
  0x1d   : > { %s141_s8 = scalar_lea.vmem (%p918_p4), %s1049_s0, %s641_s4  ;;  %s138_s20 = scalar_lea.vmem (%p918_p4), [#allocation2], %s640_s5 }
  0x1e   : > { %v175_v0 = vld [vmem:[%s141_s8] sm:$0xff] (%p918_p4)  ;;  %v177_v1 = vld [vmem:[%s141_s8 + $0x10] sm:$0xff] (%p918_p4) }
  0x1f   : > { %v179_v2 = vld [vmem:[%s141_s8 + $0x20] sm:$0xff] (%p918_p4)  ;;  %176 = vst [vmem:[%s138_s20] sm:$0xff] (%p918_p4), %v175_v0  ;;  %178 = vst [vmem:[%s138_s20 + $0x8] sm:$0xff] (%p918_p4), %v177_v1  ;;  %v181_v3 = vld [vmem:[%s141_s8 + $0x30] sm:$0xff] (%p918_p4) }
  0x20   : > { %180 = vst [vmem:[%s138_s20 + $0x10] sm:$0xff] (%p918_p4), %v179_v2  ;;  %182 = vst [vmem:[%s138_s20 + $0x18] sm:$0xff] (%p918_p4), %v181_v3 }
  0x22 PF: > { %188 = sbr.rel (!%p926_p6) target bundleno = 50 (0x32), region = 58  ;;  %s190_s21 = sand.u32 (%p926_p6), 1, %s813_s10  }
  0x23   : > { %s698_s22 = sshll.u32 (%p926_p6), %s833_s15, 5  ;;  %s642_s23 = sshll.u32 (%p926_p6), %s190_s21, 6 }
  0x24   : > { %s196_s25 = sadd.s32 (%p926_p6), %s837_s16, %s698_s22  ;;  %s192_s24 = scalar_lea.vmem (%p926_p6), [#allocation3], %s642_s23 }
  0x25   : > { %s645_s26 = sshll.u32 (%p926_p6), %s196_s25, 2 }
  0x26   : > { %s962_s4 = scalar_lea.vmem (%p926_p6), %s1050_s1, %s645_s26 }
  0x27   : > { %v214_v4 = vld [vmem:[%s962_s4] sm:$0xf] (%p926_p6)  ;;  %v216_v5 = vld [vmem:[%s962_s4 + $0x8] sm:$0xf] (%p926_p6)  ;;  %v218_v6 = vld [vmem:[%s962_s4 + $0x10] sm:$0xf] (%p926_p6) }
  0x28   : > { %215 = vst [vmem:[%s192_s24] sm:$0xf] (%p926_p6), %v214_v4  ;;  %217 = vst [vmem:[%s192_s24 + $0x4] sm:$0xf] (%p926_p6), %v216_v5  ;;  %v220_v7 = vld [vmem:[%s962_s4 + $0x18] sm:$0xf] (%p926_p6) }
  0x29   : > { %219 = vst [vmem:[%s192_s24 + $0x8] sm:$0xf] %v218_v6  ;;  %v222_v8 = vld [vmem:[%s962_s4 + $0x20] sm:$0xf]  ;;  %v224_v9 = vld [vmem:[%s962_s4 + $0x28] sm:$0xf] }
  0x2a   : > { %221 = vst [vmem:[%s192_s24 + $0xc] sm:$0xf] %v220_v7  ;;  %223 = vst [vmem:[%s192_s24 + $0x10] sm:$0xf] %v222_v8  ;;  %v226_v10 = vld [vmem:[%s962_s4 + $0x30] sm:$0xf] }
  0x2b   : > { %225 = vst [vmem:[%s192_s24 + $0x14] sm:$0xf] %v224_v9  ;;  %v228_v11 = vld [vmem:[%s962_s4 + $0x38] sm:$0xf]  ;;  %v230_v12 = vld [vmem:[%s962_s4 + $0x40] sm:$0xf] }
  0x2c   : > { %227 = vst [vmem:[%s192_s24 + $0x18] sm:$0xf] %v226_v10  ;;  %229 = vst [vmem:[%s192_s24 + $0x1c] sm:$0xf] %v228_v11  ;;  %v232_v13 = vld [vmem:[%s962_s4 + $0x48] sm:$0xf] }
  0x2d   : > { %231 = vst [vmem:[%s192_s24 + $0x20] sm:$0xf] %v230_v12  ;;  %v234_v14 = vld [vmem:[%s962_s4 + $0x50] sm:$0xf]  ;;  %v236_v15 = vld [vmem:[%s962_s4 + $0x58] sm:$0xf] }
  0x2e   : > { %233 = vst [vmem:[%s192_s24 + $0x24] sm:$0xf] %v232_v13  ;;  %235 = vst [vmem:[%s192_s24 + $0x28] sm:$0xf] %v234_v14  ;;  %v238_v16 = vld [vmem:[%s962_s4 + $0x60] sm:$0xf] }
  0x2f   : > { %237 = vst [vmem:[%s192_s24 + $0x2c] sm:$0xf] %v236_v15  ;;  %v240_v17 = vld [vmem:[%s962_s4 + $0x68] sm:$0xf]  ;;  %v242_v18 = vld [vmem:[%s962_s4 + $0x70] sm:$0xf] }
  0x30   : > { %239 = vst [vmem:[%s192_s24 + $0x30] sm:$0xf] %v238_v16  ;;  %241 = vst [vmem:[%s192_s24 + $0x34] sm:$0xf] %v240_v17  ;;  %v244_v19 = vld [vmem:[%s962_s4 + $0x78] sm:$0xf] }
  0x31   : > { %243 = vst [vmem:[%s192_s24 + $0x38] sm:$0xf] %v242_v18  ;;  %245 = vst [vmem:[%s192_s24 + $0x3c] sm:$0xf] %v244_v19 }
  0x32 PF: > { %p646_p12 = scmp.ge.s32.totalorder %s841_s17, 1  ;;  %p299_p13 = scmp.lt.s32.totalorder %s841_s17, 5 }
  0x34   : > { %p300_p0 = pnand %p646_p12, %p299_p13 }
  0x35   : > { %s306_s5 = sand.u32 (!%p300_p0), 1, %s817_s11   ;;  %s313_s6 = sand.u32 (!%p300_p0), 1, %s809_s9  }
  0x36   : > { %303 = sbr.rel (%p300_p0) target bundleno = 106 (0x6a), region = 99  ;;  %s647_s7 = sshll.u32 (!%p300_p0), %s306_s5, 5 }
  0x37   : > { %s648_s8 = sshll.u32 (!%p300_p0), %s313_s6, 6  ;;  %s308_s20 = scalar_lea.vmem (!%p300_p0), [#allocation2], %s647_s7 }
  0x38   : > { %s984_s21 = scalar_lea.vmem (!%p300_p0), [#allocation3], %s648_s8  ;;  %s986_s22 = scalar_lea.vmem (!%p300_p0), [#allocation4], %s647_s7 }
  0x39   : > { %p650_p1 = scmp.ne.s32.totalorder (!%p300_p0), %s825_s13, 0 }
  0x3d   : > { %341 = sbr.rel (%p650_p1) target bundleno = 68 (0x44), region = 111  ;;  %v342_v20 = vld [vmem:[%s308_s20] sm:$0xff] (!%p650_p1)  ;;  %v343_v21 = vld [vmem:[%s308_s20 + $0x8] sm:$0xff] (!%p650_p1)  ;;  %v344_v22 = vld [vmem:[%s308_s20 + $0x10] sm:$0xff] (!%p650_p1) }
  0x3e   : > { %346 = vst [vmem:[%s986_s22] sm:$0xff] (!%p650_p1), %v342_v20  ;;  %347 = vst [vmem:[%s986_s22 + $0x8] sm:$0xff] (!%p650_p1), %v343_v21  ;;  %v345_v23 = vld [vmem:[%s308_s20 + $0x18] sm:$0xff] (!%p650_p1) }
  0x3f   : > { %348 = vst [vmem:[%s986_s22 + $0x10] sm:$0xff] (!%p650_p1), %v344_v22  ;;  %349 = vst [vmem:[%s986_s22 + $0x18] sm:$0xff] (!%p650_p1), %v345_v23 }
  0x44 PF: > { %v651_v24 = vld [vmem:[%s984_s21 + $0xc] sm:$0xff]   ;;  %v353_v25 = vld [vmem:[%s984_s21] sm:$0xff]   ;;  %v663_v36 = vld [vmem:[%s984_s21 + $0x14] sm:$0xff]   ;;  %s695_s9 = sshll.u32 (%p936_p10), %s829_s14, 3 }
  0x45   : > { %v355_v26 = vld [vmem:[%s986_s22] sm:$0xff]  ;;  %v352_v27 = vunpack.c.l.bf16 %v651_v24  ;;  %v354_v28 = vunpack.c.l.bf16 %v353_v25  ;;  %v362_v29 = vunpack.c.h.bf16 %v353_v25  ;;  %v653_v30 = vld [vmem:[%s986_s22 + $0x8] sm:$0xff]  ;;  %v391_v45 = vunpack.c.h.bf16 %v651_v24  ;;  %v685_v11 = vld [vmem:[%s984_s21 + $0x34] sm:$0xff]   ;;  %s497_s23 = scalar_lea.vmem (%p936_p10), %s1051_s2, %s695_s9 }
  0x46   : > { %v655_v31 = vld [vmem:[%s984_s21 + $0x8] sm:$0xff]   ;;  %v656_v32 = vld [vmem:[%s986_s22 + $0x10] sm:$0xff]  ;;  %v659_v35 = vld [vmem:[%s986_s22 + $0x18] sm:$0xff]  ;;  %v399_v46 = vunpack.c.l.bf16 %v663_v36  ;;  %v407_v49 = vunpack.c.h.bf16 %v663_v36  ;;  %v467_v21 = vunpack.c.l.bf16 %v685_v11  ;;  %v475_v24 = vunpack.c.h.bf16 %v685_v11 }
  0x47   : > { %v371_v33 = vunpack.c.l.bf16 %v655_v31  ;;  %v379_v34 = vunpack.c.h.bf16 %v655_v31  ;;  %v356_v37 = vsub.f32 %v354_v28, %v355_v26  ;;  %v365_v38 = vsub.f32 %v362_v29, %v653_v30  ;;  %v669_v39 = vld [vmem:[%s984_s21 + $0x1c] ss:$16 sps:$4 sm:$0xff]   ;;  %v674_v56 = vld [vmem:[%s984_s21 + $0x24] sm:$0xff]  }
  0x48   : > { %v661_v42 = vld [vmem:[%s984_s21 + $0x1c] sm:$0xff]   ;;  %v414_v50 = vunpack.c.l.bf16 %v669_v39  ;;  %v672_v61 = vld [vmem:[%s984_s21 + $0x2c] sm:$0xff]   ;;  %v433_v1 = vunpack.c.l.bf16 %v674_v56  ;;  %v441_v4 = vunpack.c.h.bf16 %v674_v56  ;;  %v448_v5 = vunpack.c.h.bf16 %v669_v39 }
  0x49   : > { %v374_v40 = vsub.f32 %v371_v33, %v656_v32  ;;  %v382_v41 = vsub.f32 %v379_v34, %v659_v35  ;;  %v357_v43 = vmul.f32 %v356_v37, %v352_v27  ;;  %v366_v44 = vmul.f32 %v365_v38, %v352_v27  ;;  %v691_v14 = vld [vmem:[%s984_s21 + $0x3c] sm:$0xf] }
  0x4a   : > { %v388_v53 = vunpack.c.l.bf16 %v661_v42  ;;  %v425_v0 = vunpack.c.h.bf16 %v661_v42  ;;  %v422_v8 = vunpack.c.l.bf16 %v672_v61  ;;  %v683_v17 = vld [vmem:[%s984_s21 + $0x3c] sm:$0xf]  ;;  %v459_v20 = vunpack.c.h.bf16 %v672_v61 }
  0x4b   : > { %v375_v47 = vmul.f32 %v374_v40, %v352_v27  ;;  %v383_v48 = vmul.f32 %v382_v41, %v352_v27  ;;  %v358_v51 = vadd.f32 %v357_v43, %v355_v26  ;;  %v367_v52 = vadd.f32 %v653_v30, %v366_v44 }
  0x4c   : > { %v482_v25 = vunpack.c.l.bf16 %v691_v14  ;;  %v456_v28 = vunpack.c.l.bf16 %v683_v17 }
  0x4d   : > { %v376_v54 = vadd.f32 %v656_v32, %v375_v47  ;;  %v384_v55 = vadd.f32 %v659_v35, %v383_v48  ;;  %v393_v57 = vsub.f32 %v391_v45, %v358_v51  ;;  %v401_v58 = vsub.f32 %v399_v46, %v367_v52 }
  0x4f   : > { %v409_v59 = vsub.f32 %v407_v49, %v376_v54  ;;  %v416_v60 = vsub.f32 %v414_v50, %v384_v55  ;;  %v394_v62 = vmul.f32 %v393_v57, %v388_v53  ;;  %v402_v63 = vmul.f32 %v401_v58, %v388_v53 }
  0x51   : > { %v410_v2 = vmul.f32 %v409_v59, %v388_v53  ;;  %v417_v3 = vmul.f32 %v416_v60, %v388_v53  ;;  %v395_v6 = vadd.f32 %v394_v62, %v358_v51  ;;  %v403_v7 = vadd.f32 %v402_v63, %v367_v52 }
  0x53   : > { %v411_v9 = vadd.f32 %v410_v2, %v376_v54  ;;  %v418_v10 = vadd.f32 %v417_v3, %v384_v55  ;;  %v427_v12 = vsub.f32 %v425_v0, %v395_v6  ;;  %v435_v13 = vsub.f32 %v433_v1, %v403_v7 }
  0x55   : > { %v443_v15 = vsub.f32 %v441_v4, %v411_v9  ;;  %v450_v16 = vsub.f32 %v448_v5, %v418_v10  ;;  %v428_v18 = vmul.f32 %v427_v12, %v422_v8  ;;  %v436_v19 = vmul.f32 %v435_v13, %v422_v8 }
  0x57   : > { %v444_v22 = vmul.f32 %v443_v15, %v422_v8  ;;  %v451_v23 = vmul.f32 %v450_v16, %v422_v8  ;;  %v429_v26 = vadd.f32 %v428_v18, %v395_v6  ;;  %v437_v27 = vadd.f32 %v436_v19, %v403_v7 }
  0x59   : > { %v445_v29 = vadd.f32 %v444_v22, %v411_v9  ;;  %v452_v30 = vadd.f32 %v451_v23, %v418_v10  ;;  %v461_v31 = vsub.f32 %v459_v20, %v429_v26  ;;  %v469_v32 = vsub.f32 %v467_v21, %v437_v27 }
  0x5b   : > { %v477_v33 = vsub.f32 %v475_v24, %v445_v29  ;;  %v484_v34 = vsub.f32 %v482_v25, %v452_v30  ;;  %v462_v35 = vmul.f32 %v461_v31, %v456_v28  ;;  %v470_v36 = vmul.f32 %v469_v32, %v456_v28  ;;  %494 = sbr.rel (!%p936_p10) target bundleno = 106 (0x6a), region = 115 }
  0x5d   : > { %v478_v37 = vmul.f32 %v477_v33, %v456_v28  ;;  %v485_v38 = vmul.f32 %v484_v34, %v456_v28  ;;  %v463_v39 = vadd.f32 %v462_v35, %v429_v26  ;;  %v471_v40 = vadd.f32 %v470_v36, %v437_v27 }
  0x5f   : > { %v479_v41 = vadd.f32 %v478_v37, %v445_v29  ;;  %v486_v42 = vadd.f32 %v485_v38, %v452_v30  ;;  %464 = vst [vmem:[%s986_s22] sm:$0xff] %v463_v39  ;;  %687 = vst [vmem:[%s986_s22 + $0x8] sm:$0xff] %v471_v40 }
  0x61   : > { %690 = vst [vmem:[%s986_s22 + $0x10] sm:$0xff] %v479_v41  ;;  %693 = vst [vmem:[%s986_s22 + $0x18] sm:$0xff] %v486_v42 }
  0x66   : > { %v531_v43 = vld [vmem:[%s986_s22] sm:$0xff]  ;;  %v533_v44 = vld [vmem:[%s986_s22 + $0x8] sm:$0xff] }
  0x67   : > { %532 = vst [vmem:[%s497_s23] sm:$0xff] %v531_v43  ;;  %534 = vst [vmem:[%s497_s23 + $0x10] sm:$0xff] %v533_v44 }
  0x68   : > { %v535_v45 = vld [vmem:[%s986_s22 + $0x10] sm:$0xff]  ;;  %v537_v46 = vld [vmem:[%s986_s22 + $0x18] sm:$0xff] }
  0x69   : > { %536 = vst [vmem:[%s497_s23 + $0x20] sm:$0xff] %v535_v45  ;;  %538 = vst [vmem:[%s497_s23 + $0x30] sm:$0xff] %v537_v46 }
  0x6a PF: > { %s12_s17 = sadd.s32 1, %s841_s17   ;;  %s1055_s9 = smov %s813_s10 }
  0x6b   : > { %p9_p2 = scmp.ge.s32.totalorder %s12_s17, 6   ;;  %s1056_s10 = smov %s944_s30 }
  0x6c   : > { %s1057_s11 = smov %s821_s12  ;;  %s1058_s12 = smov %s941_s29 }
  0x6d   : > { %s1059_s13 = smov %s833_s15  ;;  %s1060_s14 = smov %s837_s16 }
  0x6e   : > { %s1061_s15 = smov %s1064_s18  ;;  %s1062_s16 = smov %s1068_s19 }
  0x6f   :  { %11 = sbr.rel (!%p9_p2) target bundleno = 5 (0x5), region = 210 }

</bundles_post_ra>
